<compile_context>
chip_gen: v7x
topology: tpu7x:2x2x1
jax: 0.10.0
libtpu: 0.0.40
codegen_flags: <defaults>
</compile_context>

<pallas_src>
import functools

import numpy as np
import jax
import jax.numpy as jnp
from jax.experimental import pallas as pl
from jax.experimental.pallas import tpu as pltpu


def _round_up(x: int, m: int) -> int:
    return ((x + m - 1) // m) * m


@functools.lru_cache(maxsize=None)
def _freqpass_consts(H: int, W: int, rate: float):
    """Combined real filter matrix A (and A^T) plus the per-row band mask."""
    n = np.arange(W)
    ang = 2.0 * np.pi * np.outer(n, n) / W
    Wc = np.exp(-1j * ang)                 # forward DFT:  fft(x)  == x @ Wc
    Vc = np.exp(+1j * ang) / W             # inverse DFT:  ifft(F) == F @ Vc
    cy, cx = H // 2, W // 2
    rh, rw = int(rate * cy), int(rate * cx)
    cols = np.arange(W)
    col_keep = (~((cols >= cx - rw) & (cols < cx + rw))).astype(np.float64)
    # real(ifft(fft(x) * col_keep)) == x @ A   for real x
    A = np.real((Wc * col_keep[None, :]) @ Vc).astype(np.float32)           # (W, W)
    rows = np.arange(H)
    row_in_band = ((rows >= cy - rh) & (rows < cy + rh)).astype(np.float32)  # (H,)
    return A, np.ascontiguousarray(A.T), row_in_band


def _freqpass_rows_kernel(x_ref, a_ref, m_ref, o_ref):
    # x: (TM, W), A: (W, W), m: (TM, 1) with 1.0 == row inside the zeroed band.
    x = x_ref[...]
    y = jnp.dot(x, a_ref[...], preferred_element_type=jnp.float32)
    o_ref[...] = x + m_ref[...] * (y - x)          # out-of-band rows: exact identity


def _freqpass_cols_kernel(xt_ref, at_ref, m_ref, o_ref):
    # xt: (W, TN), At: (W, W), m: (1, TN) with 1.0 == row inside the zeroed band.
    xt = xt_ref[...]
    y = jnp.dot(at_ref[...], xt, preferred_element_type=jnp.float32)
    o_ref[...] = xt + m_ref[...] * (y - xt)


def freqpass(x, rate: float = 0.95):
    """High-pass FreqPass forward. x: (B, C, H, W) -> (B, C, H, W) float32."""
    B, C, H, W = x.shape
    A_np, At_np, row_in_band = _freqpass_consts(int(H), int(W), float(rate))

    M = B * C * H
    xf = x.reshape(M, W).astype(jnp.float32)
    row_mask = np.tile(row_in_band, B * C)          # (M,) 1.0 inside the zeroed band
    a_bytes = W * W * 4

    if W >= 128:
        # Row-batched layout: output last dim = W >= 128 -> lane-dense stores.
        A = jnp.asarray(A_np)
        TM = 512 if M >= 512 else _round_up(M, 8)
        M_pad = _round_up(M, TM)
        xp = jnp.pad(xf, ((0, M_pad - M), (0, 0)))
        mp = jnp.asarray(np.pad(row_mask, (0, M_pad - M)).reshape(M_pad, 1),
                         dtype=jnp.float32)
        tile_bytes = TM * W * 4
        vmem_limit = int(min(64 * 2 ** 20,
                             max(32 * 2 ** 20, 4 * (2 * a_bytes + 4 * tile_bytes))))
        out = pl.pallas_call(
            _freqpass_rows_kernel,
            out_shape=jax.ShapeDtypeStruct((M_pad, W), jnp.float32),
            grid_spec=pltpu.PrefetchScalarGridSpec(
                num_scalar_prefetch=0,
                grid=(M_pad // TM,),
                in_specs=[
                    pl.BlockSpec((TM, W), lambda i: (i, 0)),   # row tile
                    pl.BlockSpec((W, W), lambda i: (0, 0)),    # A (constant, stays resident)
                    pl.BlockSpec((TM, 1), lambda i: (i, 0)),   # row-band mask
                ],
                out_specs=pl.BlockSpec((TM, W), lambda i: (i, 0)),
            ),
            compiler_params=pltpu.CompilerParams(
                dimension_semantics=("parallel",),
                vmem_limit_bytes=vmem_limit),
        )(xp, A, mp)
        out = out[:M]
    else:
        # W < 128: transpose so the big row-batch dim is the lane (last) dim of
        # the output tile -> unmasked, lane-dense vector stores.
        At = jnp.asarray(At_np)
        TN = min(512, _round_up(M, 128))
        M_pad = _round_up(M, TN)
        xt = jnp.pad(xf, ((0, M_pad - M), (0, 0))).T            # (W, M_pad)
        mp = jnp.asarray(np.pad(row_mask, (0, M_pad - M)).reshape(1, M_pad),
                         dtype=jnp.float32)
        tile_bytes = W * TN * 4
        vmem_limit = int(min(64 * 2 ** 20,
                             max(32 * 2 ** 20, 4 * (2 * a_bytes + 4 * tile_bytes))))
        out_t = pl.pallas_call(
            _freqpass_cols_kernel,
            out_shape=jax.ShapeDtypeStruct((W, M_pad), jnp.float32),
            grid_spec=pltpu.PrefetchScalarGridSpec(
                num_scalar_prefetch=0,
                grid=(M_pad // TN,),
                in_specs=[
                    pl.BlockSpec((W, TN), lambda j: (0, j)),   # transposed row tile
                    pl.BlockSpec((W, W), lambda j: (0, 0)),    # A^T (constant, resident)
                    pl.BlockSpec((1, TN), lambda j: (0, j)),   # row-band mask
                ],
                out_specs=pl.BlockSpec((W, TN), lambda j: (0, j)),
            ),
            compiler_params=pltpu.CompilerParams(
                dimension_semantics=("parallel",),
                vmem_limit_bytes=vmem_limit),
        )(xt, At, mp)
        out = out_t.T[:M]

    return out.reshape(B, C, H, W)


def _reference(x, rate=0.95):
    """NumPy float64 reference mirroring the simplified PyTorch semantics."""
    xn = np.asarray(x, dtype=np.float64)
    B, C, H, W = xn.shape
    cy, cx = H // 2, W // 2
    rh, rw = int(rate * cy), int(rate * cx)
    F = np.fft.fft(xn, axis=-1)                                # row-wise 1-D FFT
    rows = np.arange(H)
    cols = np.arange(W)
    band = ((rows >= cy - rh) & (rows < cy + rh))[:, None] & \
           ((cols >= cx - rw) & (cols < cx + rw))[None, :]
    F = np.where(band[None, None], 0.0, F)
    return np.real(np.fft.ifft(F, axis=-1)).astype(np.float32)


if __name__ == "__main__":
    freqpass_jit = jax.jit(freqpass, static_argnames=("rate",))

    # Primary test: the module's natural small shape (W < 128 -> transposed path).
    B, C, H, W = 2, 4, 16, 16
    key = jax.random.PRNGKey(0)
    x = jax.random.normal(key, (B, C, H, W), dtype=jnp.float32)

    y = jax.block_until_ready(freqpass_jit(x, rate=0.95))
    y_ref = _reference(x, rate=0.95)
    assert y.shape == (B, C, H, W)
    np.testing.assert_allclose(np.asarray(y), y_ref, atol=2e-4, rtol=2e-4)

    # Secondary check: exercises the W >= 128 row-batched (lane-dense) path.
    B2, C2, H2, W2 = 1, 2, 8, 128
    x2 = jax.random.normal(jax.random.PRNGKey(1), (B2, C2, H2, W2), dtype=jnp.float32)
    y2 = jax.block_until_ready(freqpass_jit(x2, rate=0.5))
    y2_ref = _reference(x2, rate=0.5)
    np.testing.assert_allclose(np.asarray(y2), y2_ref, atol=2e-3, rtol=2e-3)

    print("KERNEL_OK")
</pallas_src>

<mosaic_0001>
module attributes {stable_mosaic.version = 11 : i64} {
  func.func @_freqpass_cols_kernel(%arg0: i32, %arg1: memref<16x128xf32, #tpu.memory_space<vmem>>, %arg2: memref<16x16xf32, #tpu.memory_space<vmem>>, %arg3: memref<1x128xf32, #tpu.memory_space<vmem>>, %arg4: memref<16x128xf32, #tpu.memory_space<vmem>>) attributes {dimension_semantics = [#tpu.dimension_semantics<parallel>], iteration_bounds = array<i64: 1>, scalar_prefetch = 0 : i64, scratch_operands = 0 : i64, tpu.core_type = #tpu.core_type<tc>, window_params = [{transform_indices = @transform_0, window_bounds = array<i64: 16, 128>}, {pipeline_mode = #tpu.pipeline_mode<synchronous>, transform_indices = @transform_1, window_bounds = array<i64: 16, 16>}, {transform_indices = @transform_2, window_bounds = array<i64: 1, 128>}, {transform_indices = @transform_3, window_bounds = array<i64: 16, 128>}]} {
    %c0 = arith.constant 0 : index
    %c0_0 = arith.constant 0 : index
    %0 = vector.load %arg1[%c0, %c0_0] : memref<16x128xf32, #tpu.memory_space<vmem>>, vector<16x128xf32>
    %c0_1 = arith.constant 0 : index
    %c0_2 = arith.constant 0 : index
    %1 = vector.load %arg2[%c0_1, %c0_2] : memref<16x16xf32, #tpu.memory_space<vmem>>, vector<16x16xf32>
    %cst = arith.constant dense<0.000000e+00> : vector<16x128xf32>
    %2 = tpu.matmul %1, %0, %cst {dimension_numbers = #tpu.dot_dimension_numbers<[1], [0], [0], [1], [0, 0, 1, 1], [], []>} : vector<16x16xf32>, vector<16x128xf32>, vector<16x128xf32> -> vector<16x128xf32>
    %c0_3 = arith.constant 0 : index
    %c0_4 = arith.constant 0 : index
    %3 = vector.load %arg3[%c0_3, %c0_4] : memref<1x128xf32, #tpu.memory_space<vmem>>, vector<1x128xf32>
    %4 = arith.subf %2, %0 : vector<16x128xf32>
    %5 = vector.broadcast %3 : vector<1x128xf32> to vector<16x128xf32>
    %6 = arith.mulf %5, %4 : vector<16x128xf32>
    %7 = arith.addf %0, %6 : vector<16x128xf32>
    %c0_5 = arith.constant 0 : index
    %c0_6 = arith.constant 0 : index
    %8 = vector.load %arg4[%c0_5, %c0_6] : memref<16x128xf32, #tpu.memory_space<vmem>>, vector<16x128xf32>
    tpu.vector_store %arg4[%c0_5, %c0_6], %7 {strides = array<i32>} : memref<16x128xf32, #tpu.memory_space<vmem>>, vector<16x128xf32>,
    return
  }
  func.func @transform_0(%arg0: i32) -> (i32, i32) {
    %c0_i32 = arith.constant 0 : i32
    %c0_i32_0 = arith.constant 0 : i32
    return %c0_i32, %arg0 : i32, i32
  }
  func.func @transform_1(%arg0: i32) -> (i32, i32) {
    %c0_i32 = arith.constant 0 : i32
    %c0_i32_0 = arith.constant 0 : i32
    %c0_i32_1 = arith.constant 0 : i32
    return %c0_i32, %c0_i32_0 : i32, i32
  }
  func.func @transform_2(%arg0: i32) -> (i32, i32) {
    %c0_i32 = arith.constant 0 : i32
    %c0_i32_0 = arith.constant 0 : i32
    return %c0_i32, %arg0 : i32, i32
  }
  func.func @transform_3(%arg0: i32) -> (i32, i32) {
    %c0_i32 = arith.constant 0 : i32
    %c0_i32_0 = arith.constant 0 : i32
    return %c0_i32, %arg0 : i32, i32
  }
}

</mosaic_0001>

<bundles_post_ra>
// kernel: freqpass.1
= control target key start
LH: loop header
LB: loop body
LE: loop exit
PB: predicated region body
PF: predicated region fallthrough
CT: control target
= control target key end

     0   :  { %vm18_vm0 = vcmask 130048   ;;  %s178_s0 = inlined_call_operand.vmem [shape: f32[16,128], index: 0, kind: input, shape index: {}]   ;;  %s179_s1 = inlined_call_operand.vmem [shape: f32[16,16], index: 1, kind: input, shape index: {}]   ;;  %s180_s2 = inlined_call_operand.vmem [shape: f32[1,128], index: 2, kind: input, shape index: {}]   ;;  %s181_s3 = inlined_call_operand.vmem [shape: f32[16,128], index: 3, kind: output, shape index: {}]  }
   0x1   :  { %v14_v0 = vld [vmem:[%s178_s0] sm:$0xff]  ;;  %v15_v1 = vld [vmem:[%s178_s0 + $0x8] sm:$0xff] }
   0x2   :  { %v16_v2 = vld [vmem:[%s179_s1] sm:$0xff]  ;;  %v133_v3 = vpack.c.bf16 %v15_v1, %v14_v0  ;;  %v17_v4 = vld [vmem:[%s179_s1 + $0x8] sm:$0xff] }
   0x3   :  { %130 = vmatprep.mubr.msk.f32.mxu0 %vm18_vm0, %v16_v2  ;;  %v121_v6 = vld [vmem:[%s180_s2] ss:$0 sm:$0xff] }
   0x4   :  { %134 = vmatprep.subr.bf16.mxu0 %v133_v3 }
   0x5   :  { %136 = vmatpush3.bf16.msra.mxu0 %v133_v3 }
   0x8   :  { %131 = vmatmul.mubr.msk.f32.vlgmr.msra.gmra.mrb[0].mxu0 %vm18_vm0, %v17_v4 }
  0xdb   :  { %v132_v5 = vpop.f32.mrb[0].mxu0 }
  0xdc   :  { %v102_v7 = vsub.f32 %v132_v5, %v15_v1  ;;  %v91_v8 = vpop.f32.mrb[1].mxu0 }
  0xdd   :  { %v101_v9 = vsub.f32 %v91_v8, %v14_v0 }
  0xde   :  { %v110_v10 = vmul.f32 %v121_v6, %v102_v7 }
  0xdf   :  { %v109_v11 = vmul.f32 %v121_v6, %v101_v9 }
  0xe0   :  { %v112_v12 = vadd.f32 %v110_v10, %v15_v1 }
  0xe1   :  { %v111_v13 = vadd.f32 %v109_v11, %v14_v0 }
  0xe2   :  { %114 = vst [vmem:[%s181_s3 + $0x8] sm:$0xff] %v112_v12 }
  0xe3   :  { %113 = vst [vmem:[%s181_s3] sm:$0xff] %v111_v13 }

</bundles_post_ra>
